<compile_context>
chip_gen: v6e
topology: v6e:2x2x1
jax: 0.10.0
libtpu: 0.0.40
codegen_flags: <defaults>
</compile_context>

<pallas_src>
import numpy as np
import jax
import jax.numpy as jnp
from jax.experimental import pallas as pl
from jax.experimental.pallas import tpu as pltpu

LANE = 128          # hidden (lane) dims padded to a multiple of the vreg lane width
DEFAULT_TB = 2048   # batch-tile rows; fat tiles amortize the ~0.35us/step overhead and
                    # keep the states DMA near HBM roofline.  Sweep 1024-4096 if needed.
_LN_EPS = 1e-5


def _round_up(x, m):
    return (x + m - 1) // m * m


def _make_kernel(hidden_dims, matmul_dtype):
    n_layers = len(hidden_dims)

    def kernel(x_ref, *refs):
        out_ref = refs[-1]
        p = refs[:-1]

        h = x_ref[...]
        k = 0
        normed = None
        for li, real_dim in enumerate(hidden_dims):
            w_ref, b_ref = p[k], p[k + 1]
            k += 2
            # Linear on the MXU, f32 accumulation. Weights are pre-cast to matmul_dtype
            # in prepare_params (no per-step weight cast); only the activation is cast.
            h = jnp.dot(h.astype(matmul_dtype), w_ref[...],
                        preferred_element_type=jnp.float32) + b_ref[...]
            # LayerNorm stats in f32. Padded lanes of h are exact zeros (zero-padded
            # weight cols / bias), so the lane sums already cover only the real lanes;
            # E[x^2]-mean^2 avoids the iota+where variance mask of the centered form.
            inv_n = 1.0 / real_dim
            mean = jnp.sum(h, axis=-1, keepdims=True) * inv_n
            var = jnp.sum(h * h, axis=-1, keepdims=True) * inv_n - mean * mean
            normed = (h - mean) * jax.lax.rsqrt(var + _LN_EPS)
            if li < n_layers - 1:                      # affine + ReLU on all but last
                g_ref, be_ref = p[k], p[k + 1]
                k += 2
                h = jnp.maximum(normed * g_ref[...] + be_ref[...], 0.0)

        # Value head with the last LN affine folded in (wv_eff = gamma*wv,
        # bv_eff = beta.wv + bv): a VPU multiply + lane reduction instead of a
        # degenerate (TB, H) @ (H, 1) MXU pass.  wv_eff is zero in padded lanes, so the
        # (nonzero) padded lanes of `normed` never contribute.
        wv_ref, bv_ref = p[k], p[k + 1]
        out_ref[...] = (jnp.sum(normed * wv_ref[...], axis=-1, keepdims=True)
                        + bv_ref[...])

    return kernel


def prepare_params(params, state_dim, hidden_dims, matmul_dtype=jnp.float32):
    """One-time parameter prep (call once, reuse across forward calls).

    Zero-pads every hidden (lane) dim to a multiple of 128, casts matmul weights to
    `matmul_dtype`, and folds the last layer's LayerNorm affine into the value head.
    """
    n = len(hidden_dims)
    assert n >= 1 and len(params) == 4 * n + 2
    prepared = []
    prev_real, prev_pad = state_dim, state_dim    # states feature dim stays unpadded
    last_ln = None
    k = 0
    for li, dim in enumerate(hidden_dims):
        d_pad = _round_up(dim, LANE)
        w, b, g, be = params[k:k + 4]
        k += 4
        w_p = (jnp.zeros((prev_pad, d_pad), jnp.float32)
               .at[:prev_real, :dim].set(w).astype(matmul_dtype))
        b_p = jnp.zeros((1, d_pad), jnp.float32).at[:, :dim].set(b.reshape(1, -1))
        prepared += [w_p, b_p]
        if li < n - 1:
            g_p = jnp.zeros((1, d_pad), jnp.float32).at[:, :dim].set(g.reshape(1, -1))
            be_p = jnp.zeros((1, d_pad), jnp.float32).at[:, :dim].set(be.reshape(1, -1))
            prepared += [g_p, be_p]
        else:
            last_ln = (g.reshape(-1), be.reshape(-1), dim, d_pad)
        prev_real, prev_pad = dim, d_pad

    wv, bv = params[k], params[k + 1]
    g_l, be_l, dim_l, d_pad_l = last_ln
    wv_flat = wv.reshape(-1).astype(jnp.float32)
    wv_eff = jnp.zeros((1, d_pad_l), jnp.float32).at[0, :dim_l].set(g_l * wv_flat)
    bv_eff = (jnp.sum(be_l * wv_flat) + bv.reshape(()).astype(jnp.float32)).reshape(1, 1)
    prepared += [wv_eff, bv_eff]
    return tuple(prepared)


def ppo_critic_forward(states, prepared, hidden_dims, *, tb=DEFAULT_TB,
                       matmul_dtype=jnp.float32, single_buffer_params=False):
    """states: (B, state_dim). prepared: output of prepare_params. Returns (B, 1) f32.

    matmul_dtype=jnp.bfloat16 is recommended on v5e (bf16-only MXU) and for large
    hidden dims on v6e/v7x; accumulation and LayerNorm stats stay f32 either way.
    single_buffer_params=True single-buffers the VMEM-resident weights (pl.Buffered(1))
    to free headroom under v7x's 64 MiB VMEM when hidden dims / TB are large.
    """
    if states.ndim == 1:
        states = states[None, :]
    B, S = states.shape
    if states.dtype != matmul_dtype:
        states = states.astype(matmul_dtype)      # no-op/copy-free in the default f32 path

    # Batch tile: multiple of 8 sublanes; cap so num_tiles >= 2 whenever possible so the
    # ("parallel",) grid axis can feed both TensorCores on v7x. Ragged last tile is
    # handled by Pallas (OOB reads are masked garbage in independent rows; OOB writes
    # are dropped) — no padded copy of the dominant `states` HBM stream.
    TB = max(8, min(tb, _round_up(pl.cdiv(B, 2), 8)))
    num_tiles = pl.cdiv(B, TB)

    x_spec = pl.BlockSpec((TB, S), lambda i: (i, 0))
    const_map = lambda i: (0, 0)                   # params DMA'd once, VMEM-resident
    if single_buffer_params:
        w_specs = [pl.BlockSpec(p.shape, const_map, pipeline_mode=pl.Buffered(1))
                   for p in prepared]
    else:
        w_specs = [pl.BlockSpec(p.shape, const_map) for p in prepared]

    out_shape = jax.ShapeDtypeStruct((B, 1), jnp.float32)
    out_spec = pl.BlockSpec((TB, 1), lambda i: (i, 0))

    # VMEM budget: double-buffered states blocks + (double-)buffered resident params +
    # activation headroom. Only raise the scoped limit when the default would be tight;
    # 64 MiB cap is safe on v5e/v6e (128 MiB physical) and v7x (64 MiB physical).
    x_item = np.dtype(matmul_dtype).itemsize
    param_bytes = sum(int(p.size) * p.dtype.itemsize for p in prepared)
    param_bufs = 1 if single_buffer_params else 2
    max_h = max(_round_up(d, LANE) for d in hidden_dims)
    vmem_est = (2 * TB * S * x_item + param_bufs * param_bytes
                + 2 * TB * 4 + 6 * TB * max_h * 4)
    vmem_limit = None
    if vmem_est > (14 << 20):
        vmem_limit = int(min(max(vmem_est * 5 // 4, 32 << 20), 64 << 20))

    # Advisory cost estimate so XLA schedules the custom call sensibly in a PPO step.
    chain = [S] + [_round_up(d, LANE) for d in hidden_dims]
    flops = 2 * B * (sum(a * b for a, b in zip(chain[:-1], chain[1:])) + chain[-1])
    cost = pl.CostEstimate(flops=flops, transcendentals=B * len(hidden_dims),
                           bytes_accessed=B * S * x_item + param_bytes + B * 4)

    kernel = _make_kernel(tuple(hidden_dims), matmul_dtype)

    return pl.pallas_call(
        kernel,
        out_shape=out_shape,
        grid=(num_tiles,),
        in_specs=[x_spec] + w_specs,
        out_specs=out_spec,
        compiler_params=pltpu.CompilerParams(
            dimension_semantics=("parallel",),     # batch tiles are independent
            vmem_limit_bytes=vmem_limit),
        cost_estimate=cost,
    )(states, *prepared)


def init_params(key, state_dim, hidden_dims):
    """Deterministic PyTorch-style (uniform +-1/sqrt(fan_in)) init; real (unpadded) dims."""
    params = []
    prev = state_dim
    keys = jax.random.split(key, 2 * len(hidden_dims) + 2)
    ki = 0
    for dim in hidden_dims:
        bound = 1.0 / (prev ** 0.5)
        w = jax.random.uniform(keys[ki], (prev, dim), jnp.float32, -bound, bound); ki += 1
        b = jax.random.uniform(keys[ki], (1, dim), jnp.float32, -bound, bound); ki += 1
        gamma = jnp.ones((1, dim), jnp.float32)
        beta = jnp.zeros((1, dim), jnp.float32)
        params.extend([w, b, gamma, beta])
        prev = dim
    bound = 1.0 / (prev ** 0.5)
    wv = jax.random.uniform(keys[ki], (prev, 1), jnp.float32, -bound, bound); ki += 1
    bv = jax.random.uniform(keys[ki], (1, 1), jnp.float32, -bound, bound); ki += 1
    params.extend([wv, bv])
    return tuple(params)


def reference_forward(states, params, hidden_dims):
    h = states
    k = 0
    for i, _ in enumerate(hidden_dims):
        w, b, g, be = params[k:k + 4]
        k += 4
        h = h @ w + b
        mean = jnp.mean(h, axis=-1, keepdims=True)
        var = jnp.mean((h - mean) ** 2, axis=-1, keepdims=True)
        h = (h - mean) * jax.lax.rsqrt(var + _LN_EPS) * g + be
        if i < len(hidden_dims) - 1:
            h = jnp.maximum(h, 0.0)
    wv, bv = params[k], params[k + 1]
    return h @ wv + bv


if __name__ == "__main__":
    state_dim = 16
    hidden_dims = (32, 32)
    batch = 2

    key = jax.random.PRNGKey(0)
    k_params, k_x = jax.random.split(key)
    params = init_params(k_params, state_dim, hidden_dims)
    states = jax.random.normal(k_x, (batch, state_dim), jnp.float32)

    prepared = prepare_params(params, state_dim, hidden_dims)   # one-time prep
    out = ppo_critic_forward(states, prepared, hidden_dims)
    out = jax.block_until_ready(out)                            # test-only sync

    ref = reference_forward(states, params, hidden_dims)
    assert out.shape == (batch, 1)
    assert jnp.allclose(out, ref, atol=1e-5, rtol=1e-5), (out, ref)

    print("KERNEL_OK")
</pallas_src>

<mosaic_0001>
module attributes {stable_mosaic.version = 11 : i64} {
  func.func @kernel(%arg0: i32, %arg1: memref<8x16xf32, #tpu.memory_space<vmem>>, %arg2: memref<16x128xf32, #tpu.memory_space<vmem>>, %arg3: memref<1x128xf32, #tpu.memory_space<vmem>>, %arg4: memref<1x128xf32, #tpu.memory_space<vmem>>, %arg5: memref<1x128xf32, #tpu.memory_space<vmem>>, %arg6: memref<128x128xf32, #tpu.memory_space<vmem>>, %arg7: memref<1x128xf32, #tpu.memory_space<vmem>>, %arg8: memref<1x128xf32, #tpu.memory_space<vmem>>, %arg9: memref<1x1xf32, #tpu.memory_space<vmem>>, %arg10: memref<8x1xf32, #tpu.memory_space<vmem>>) attributes {dimension_semantics = [#tpu.dimension_semantics<parallel>], iteration_bounds = array<i64: 1>, scalar_prefetch = 0 : i64, scratch_operands = 0 : i64, tpu.core_type = #tpu.core_type<tc>, window_params = [{transform_indices = @transform_0, window_bounds = array<i64: 8, 16>}, {pipeline_mode = #tpu.pipeline_mode<synchronous>, transform_indices = @transform_1, window_bounds = array<i64: 16, 128>}, {pipeline_mode = #tpu.pipeline_mode<synchronous>, transform_indices = @transform_2, window_bounds = array<i64: 1, 128>}, {pipeline_mode = #tpu.pipeline_mode<synchronous>, transform_indices = @transform_3, window_bounds = array<i64: 1, 128>}, {pipeline_mode = #tpu.pipeline_mode<synchronous>, transform_indices = @transform_4, window_bounds = array<i64: 1, 128>}, {pipeline_mode = #tpu.pipeline_mode<synchronous>, transform_indices = @transform_5, window_bounds = array<i64: 128, 128>}, {pipeline_mode = #tpu.pipeline_mode<synchronous>, transform_indices = @transform_6, window_bounds = array<i64: 1, 128>}, {pipeline_mode = #tpu.pipeline_mode<synchronous>, transform_indices = @transform_7, window_bounds = array<i64: 1, 128>}, {pipeline_mode = #tpu.pipeline_mode<synchronous>, transform_indices = @transform_8, window_bounds = array<i64: 1, 1>}, {transform_indices = @transform_9, window_bounds = array<i64: 8, 1>}]} {
    %c0 = arith.constant 0 : index
    %c0_0 = arith.constant 0 : index
    %0 = vector.load %arg1[%c0, %c0_0] : memref<8x16xf32, #tpu.memory_space<vmem>>, vector<8x16xf32>
    %c0_1 = arith.constant 0 : index
    %c0_2 = arith.constant 0 : index
    %1 = vector.load %arg2[%c0_1, %c0_2] : memref<16x128xf32, #tpu.memory_space<vmem>>, vector<16x128xf32>
    %cst = arith.constant dense<0.000000e+00> : vector<8x128xf32>
    %2 = tpu.matmul %0, %1, %cst {dimension_numbers = #tpu.dot_dimension_numbers<[1], [0], [0], [1], [0, 0, 1, 1], [], []>} : vector<8x16xf32>, vector<16x128xf32>, vector<8x128xf32> -> vector<8x128xf32>
    %c0_3 = arith.constant 0 : index
    %c0_4 = arith.constant 0 : index
    %3 = vector.load %arg3[%c0_3, %c0_4] : memref<1x128xf32, #tpu.memory_space<vmem>>, vector<1x128xf32>
    %4 = vector.broadcast %3 : vector<1x128xf32> to vector<8x128xf32>
    %5 = arith.addf %2, %4 : vector<8x128xf32>
    %cst_5 = arith.constant dense<0.000000e+00> : vector<8xf32>
    %6 = vector.multi_reduction <add>, %5, %cst_5 [1] : vector<8x128xf32> to vector<8xf32>
    %7 = vector.shape_cast %6 : vector<8xf32> to vector<8x1xf32>
    %cst_6 = arith.constant 3.125000e-02 : f32
    %8 = vector.broadcast %cst_6 : f32 to vector<8x1xf32>
    %9 = arith.mulf %7, %8 : vector<8x1xf32>
    %10 = arith.mulf %5, %5 : vector<8x128xf32>
    %cst_7 = arith.constant dense<0.000000e+00> : vector<8xf32>
    %11 = vector.multi_reduction <add>, %10, %cst_7 [1] : vector<8x128xf32> to vector<8xf32>
    %12 = vector.shape_cast %11 : vector<8xf32> to vector<8x1xf32>
    %cst_8 = arith.constant 3.125000e-02 : f32
    %13 = vector.broadcast %cst_8 : f32 to vector<8x1xf32>
    %14 = arith.mulf %12, %13 : vector<8x1xf32>
    %15 = arith.mulf %9, %9 : vector<8x1xf32>
    %16 = arith.subf %14, %15 : vector<8x1xf32>
    %17 = vector.broadcast %9 : vector<8x1xf32> to vector<8x128xf32>
    %18 = arith.subf %5, %17 : vector<8x128xf32>
    %cst_9 = arith.constant 9.99999974E-6 : f32
    %19 = vector.broadcast %cst_9 : f32 to vector<8x1xf32>
    %20 = arith.addf %16, %19 : vector<8x1xf32>
    %21 = math.rsqrt %20 : vector<8x1xf32>
    %22 = vector.broadcast %21 : vector<8x1xf32> to vector<8x128xf32>
    %23 = arith.mulf %18, %22 : vector<8x128xf32>
    %c0_10 = arith.constant 0 : index
    %c0_11 = arith.constant 0 : index
    %24 = vector.load %arg4[%c0_10, %c0_11] : memref<1x128xf32, #tpu.memory_space<vmem>>, vector<1x128xf32>
    %25 = vector.broadcast %24 : vector<1x128xf32> to vector<8x128xf32>
    %26 = arith.mulf %23, %25 : vector<8x128xf32>
    %c0_12 = arith.constant 0 : index
    %c0_13 = arith.constant 0 : index
    %27 = vector.load %arg5[%c0_12, %c0_13] : memref<1x128xf32, #tpu.memory_space<vmem>>, vector<1x128xf32>
    %28 = vector.broadcast %27 : vector<1x128xf32> to vector<8x128xf32>
    %29 = arith.addf %26, %28 : vector<8x128xf32>
    %cst_14 = arith.constant 0.000000e+00 : f32
    %30 = vector.broadcast %cst_14 : f32 to vector<8x128xf32>
    %31 = arith.maximumf %29, %30 : vector<8x128xf32>
    %c0_15 = arith.constant 0 : index
    %c0_16 = arith.constant 0 : index
    %32 = vector.load %arg6[%c0_15, %c0_16] : memref<128x128xf32, #tpu.memory_space<vmem>>, vector<128x128xf32>
    %cst_17 = arith.constant dense<0.000000e+00> : vector<8x128xf32>
    %33 = tpu.matmul %31, %32, %cst_17 {dimension_numbers = #tpu.dot_dimension_numbers<[1], [0], [0], [1], [0, 0, 1, 1], [], []>} : vector<8x128xf32>, vector<128x128xf32>, vector<8x128xf32> -> vector<8x128xf32>
    %c0_18 = arith.constant 0 : index
    %c0_19 = arith.constant 0 : index
    %34 = vector.load %arg7[%c0_18, %c0_19] : memref<1x128xf32, #tpu.memory_space<vmem>>, vector<1x128xf32>
    %35 = vector.broadcast %34 : vector<1x128xf32> to vector<8x128xf32>
    %36 = arith.addf %33, %35 : vector<8x128xf32>
    %cst_20 = arith.constant dense<0.000000e+00> : vector<8xf32>
    %37 = vector.multi_reduction <add>, %36, %cst_20 [1] : vector<8x128xf32> to vector<8xf32>
    %38 = vector.shape_cast %37 : vector<8xf32> to vector<8x1xf32>
    %cst_21 = arith.constant 3.125000e-02 : f32
    %39 = vector.broadcast %cst_21 : f32 to vector<8x1xf32>
    %40 = arith.mulf %38, %39 : vector<8x1xf32>
    %41 = arith.mulf %36, %36 : vector<8x128xf32>
    %cst_22 = arith.constant dense<0.000000e+00> : vector<8xf32>
    %42 = vector.multi_reduction <add>, %41, %cst_22 [1] : vector<8x128xf32> to vector<8xf32>
    %43 = vector.shape_cast %42 : vector<8xf32> to vector<8x1xf32>
    %cst_23 = arith.constant 3.125000e-02 : f32
    %44 = vector.broadcast %cst_23 : f32 to vector<8x1xf32>
    %45 = arith.mulf %43, %44 : vector<8x1xf32>
    %46 = arith.mulf %40, %40 : vector<8x1xf32>
    %47 = arith.subf %45, %46 : vector<8x1xf32>
    %48 = vector.broadcast %40 : vector<8x1xf32> to vector<8x128xf32>
    %49 = arith.subf %36, %48 : vector<8x128xf32>
    %cst_24 = arith.constant 9.99999974E-6 : f32
    %50 = vector.broadcast %cst_24 : f32 to vector<8x1xf32>
    %51 = arith.addf %47, %50 : vector<8x1xf32>
    %52 = math.rsqrt %51 : vector<8x1xf32>
    %53 = vector.broadcast %52 : vector<8x1xf32> to vector<8x128xf32>
    %54 = arith.mulf %49, %53 : vector<8x128xf32>
    %c0_25 = arith.constant 0 : index
    %c0_26 = arith.constant 0 : index
    %55 = vector.load %arg8[%c0_25, %c0_26] : memref<1x128xf32, #tpu.memory_space<vmem>>, vector<1x128xf32>
    %56 = vector.broadcast %55 : vector<1x128xf32> to vector<8x128xf32>
    %57 = arith.mulf %54, %56 : vector<8x128xf32>
    %cst_27 = arith.constant dense<0.000000e+00> : vector<8xf32>
    %58 = vector.multi_reduction <add>, %57, %cst_27 [1] : vector<8x128xf32> to vector<8xf32>
    %59 = vector.shape_cast %58 : vector<8xf32> to vector<8x1xf32>
    %c0_28 = arith.constant 0 : index
    %c0_29 = arith.constant 0 : index
    %60 = vector.load %arg9[%c0_28, %c0_29] : memref<1x1xf32, #tpu.memory_space<vmem>>, vector<1x1xf32>
    %61 = vector.broadcast %60 : vector<1x1xf32> to vector<8x1xf32>
    %62 = arith.addf %59, %61 : vector<8x1xf32>
    %c0_30 = arith.constant 0 : index
    %c0_31 = arith.constant 0 : index
    %63 = vector.load %arg10[%c0_30, %c0_31] : memref<8x1xf32, #tpu.memory_space<vmem>>, vector<8x1xf32>
    tpu.vector_store %arg10[%c0_30, %c0_31], %62 {strides = array<i32>} : memref<8x1xf32, #tpu.memory_space<vmem>>, vector<8x1xf32>,
    return
  }
  func.func @transform_0(%arg0: i32) -> (i32, i32) {
    %c0_i32 = arith.constant 0 : i32
    %c0_i32_0 = arith.constant 0 : i32
    return %arg0, %c0_i32 : i32, i32
  }
  func.func @transform_1(%arg0: i32) -> (i32, i32) {
    %c0_i32 = arith.constant 0 : i32
    %c0_i32_0 = arith.constant 0 : i32
    %c0_i32_1 = arith.constant 0 : i32
    return %c0_i32, %c0_i32_0 : i32, i32
  }
  func.func @transform_2(%arg0: i32) -> (i32, i32) {
    %c0_i32 = arith.constant 0 : i32
    %c0_i32_0 = arith.constant 0 : i32
    %c0_i32_1 = arith.constant 0 : i32
    return %c0_i32, %c0_i32_0 : i32, i32
  }
  func.func @transform_3(%arg0: i32) -> (i32, i32) {
    %c0_i32 = arith.constant 0 : i32
    %c0_i32_0 = arith.constant 0 : i32
    %c0_i32_1 = arith.constant 0 : i32
    return %c0_i32, %c0_i32_0 : i32, i32
  }
  func.func @transform_4(%arg0: i32) -> (i32, i32) {
    %c0_i32 = arith.constant 0 : i32
    %c0_i32_0 = arith.constant 0 : i32
    %c0_i32_1 = arith.constant 0 : i32
    return %c0_i32, %c0_i32_0 : i32, i32
  }
  func.func @transform_5(%arg0: i32) -> (i32, i32) {
    %c0_i32 = arith.constant 0 : i32
    %c0_i32_0 = arith.constant 0 : i32
    %c0_i32_1 = arith.constant 0 : i32
    return %c0_i32, %c0_i32_0 : i32, i32
  }
  func.func @transform_6(%arg0: i32) -> (i32, i32) {
    %c0_i32 = arith.constant 0 : i32
    %c0_i32_0 = arith.constant 0 : i32
    %c0_i32_1 = arith.constant 0 : i32
    return %c0_i32, %c0_i32_0 : i32, i32
  }
  func.func @transform_7(%arg0: i32) -> (i32, i32) {
    %c0_i32 = arith.constant 0 : i32
    %c0_i32_0 = arith.constant 0 : i32
    %c0_i32_1 = arith.constant 0 : i32
    return %c0_i32, %c0_i32_0 : i32, i32
  }
  func.func @transform_8(%arg0: i32) -> (i32, i32) {
    %c0_i32 = arith.constant 0 : i32
    %c0_i32_0 = arith.constant 0 : i32
    %c0_i32_1 = arith.constant 0 : i32
    return %c0_i32, %c0_i32_0 : i32, i32
  }
  func.func @transform_9(%arg0: i32) -> (i32, i32) {
    %c0_i32 = arith.constant 0 : i32
    %c0_i32_0 = arith.constant 0 : i32
    return %arg0, %c0_i32 : i32, i32
  }
}

</mosaic_0001>

<bundles_post_ra>
// kernel: tpu_custom_call.1
= control target key start
LH: loop header
LB: loop body
LE: loop exit
PB: predicated region body
PF: predicated region fallthrough
CT: control target
= control target key end

     0   :  { %s580_s0 = inlined_call_operand.vmem [shape: f32[2,16], index: 0, kind: input, shape index: {}]   ;;  %s581_s1 = inlined_call_operand.hbm [shape: f32[16,128], index: 1, kind: input, shape index: {}]   ;;  %s582_s2 = inlined_call_operand.vmem [shape: f32[1,128], index: 2, kind: input, shape index: {}]   ;;  %s583_s3 = inlined_call_operand.vmem [shape: f32[1,128], index: 3, kind: input, shape index: {}]   ;;  %s584_s4 = inlined_call_operand.vmem [shape: f32[1,128], index: 4, kind: input, shape index: {}]   ;;  %s585_s5 = inlined_call_operand.hbm [shape: f32[128,128], index: 5, kind: input, shape index: {}]   ;;  %s586_s6 = inlined_call_operand.vmem [shape: f32[1,128], index: 6, kind: input, shape index: {}]   ;;  %s587_s7 = inlined_call_operand.vmem [shape: f32[1,128], index: 7, kind: input, shape index: {}]   ;;  %s588_s8 = inlined_call_operand.<no memory space> [shape: f32[1,1], index: 8, kind: input, shape index: {}]   ;;  %s589_s9 = inlined_call_operand.vmem [shape: f32[2,1], index: 9, kind: output, shape index: {}]  }
   0x1   :  { %v14_v0 = vstv %s588_s8 }
   0x2   :  { %15 = vst [vmem:[#allocation2] sm:$0x1] %v14_v0 }
   0x3   :  { %16 = vsyncpa [#allocation4], 0 }
   0x4   :  { %17 = vsyncpa [#allocation6], 0  ;;  %s468_s11 = smov [#allocation3]  }
   0x5   :  { %s25_s12 = sshll.u32 %s468_s11, 4  ;;  %s26_s12 = int_to_ptr.vmem [resolvable:$true] %s25_s12 }
   0x6   :  { %s432_s13 = scalar_lea.vmem %s26_s12, 256  ;;  %p437_p1 = scmp.lt.s32.totalorder %s26_s12, %s26_s12 }
   0x7   :  { %p433_p0 = scmp.ne.s32.totalorder %s26_s12, %s432_s13  ;;  %p438_p2 = scmp.lt.s32.totalorder %s432_s13, %s432_s13 }
   0x9   :  { %p439_p3 = por %p438_p2, %p437_p1 }
   0xb   :  { %p440_p4 = pnand %p439_p3, %p433_p0 }
   0xd   :  { %443 = shalt.err (!%p440_p4)
}
   0xe   :  { %s469_s14 = smov 128   ;;  %s470_s15 = smov 8  }
   0xf   :  { %31 = dma.hbm_to_vmem [thread:$0]  %s581_s1, 256, %s26_s12, [#allocation4], %s469_s14, %s469_s14, %s470_s15  }
  0x10   :  { %s471_s8 = smov [#allocation5]  }
  0x11   :  { %s43_s18 = sshll.u32 %s471_s8, 4  ;;  %s44_s18 = int_to_ptr.vmem [resolvable:$true] %s43_s18 }
  0x12   :  { %s452_s19 = scalar_lea.vmem %s44_s18, 2048  ;;  %p457_p6 = scmp.lt.s32.totalorder %s44_s18, %s44_s18 }
  0x13   :  { %p453_p5 = scmp.ne.s32.totalorder %s44_s18, %s452_s19  ;;  %p458_p7 = scmp.lt.s32.totalorder %s452_s19, %s452_s19 }
  0x15   :  { %p459_p8 = por %p458_p7, %p457_p6 }
  0x17   :  { %p460_p9 = pnand %p459_p8, %p453_p5 }
  0x19   :  { %463 = shalt.err (!%p460_p9)
}
  0x1a   :  { %49 = dma.hbm_to_vmem [thread:$0]  %s585_s5, 2048, %s44_s18, [#allocation6], %s469_s14, %s469_s14, %s470_s15  }
  0x1b   :  { %464 = dma.done.wait [#allocation4], 256  }
  0x1c   :  { %465 = vsyncadd [#allocation4], 4294967040 }
  0x1d   :  { %466 = dma.done.wait [#allocation6], 2048  }
  0x1e   :  { %467 = vsyncadd [#allocation6], 4294965248  ;;  %v472_v1 = vmov 0.0   ;;  %vm473_vm0 = vmmov 0   ;;  %v64_v2 = vld [vmem:[#allocation3 + $0x8] sm:$0xff]  ;;  %v63_v3 = vld [vmem:[#allocation3] sm:$0xff] }
  0x1f   :  { %372 = vmatprep.subr.mxu0 %v472_v1  ;;  %376 = vmatprep.mubr.msk.f32.mxu0 %vm473_vm0, %v472_v1  ;;  %v62_v4 = vld [vmem:[%s580_s0] sm:$0xff]  ;;  %vm72_vm1 = vcmask 130048   ;;  %v191_v10 = vld [vmem:[#allocation5 + $0x78] sm:$0xff]  ;;  %v188_v13 = vld [vmem:[#allocation5 + $0x60] sm:$0xff]  ;;  %vm300_vm2 = vcmask 7168  }
  0x20   :  { %379 = vmatprep.subr.mxu1 %v472_v1  ;;  %411 = vmatprep.mubr.msk.f32.mxu1 %vm473_vm0, %v472_v1  ;;  %v345_v5 = vld [vmem:[%s582_s2] ss:$0 sm:$0xff]  ;;  %v190_v11 = vld [vmem:[#allocation5 + $0x70] sm:$0xff]  ;;  %v187_v14 = vld [vmem:[#allocation5 + $0x58] sm:$0xff] }
  0x21   :  { %373 = vmatpush3.msra.mxu0 %v64_v2  ;;  %380 = vmatpush3.msra.mxu1 %v191_v10  ;;  %v189_v12 = vld [vmem:[#allocation5 + $0x68] sm:$0xff]  ;;  %v186_v15 = vld [vmem:[#allocation5 + $0x50] sm:$0xff]  ;;  %v184_v17 = vld [vmem:[#allocation5 + $0x40] sm:$0xff] }
  0x22   :  { %374 = vmatprep.subr.mxu0 %v472_v1  ;;  %381 = vmatprep.subr.mxu1 %v472_v1  ;;  %v185_v16 = vld [vmem:[#allocation5 + $0x48] sm:$0xff]  ;;  %v183_v18 = vld [vmem:[#allocation5 + $0x38] sm:$0xff]  ;;  %v182_v19 = vld [vmem:[#allocation5 + $0x30] sm:$0xff] }
  0x23   :  { %375 = vmatpush3.msra.mxu0 %v63_v3  ;;  %382 = vmatpush3.msra.mxu1 %v190_v11  ;;  %v181_v20 = vld [vmem:[#allocation5 + $0x28] sm:$0xff]  ;;  %v180_v21 = vld [vmem:[#allocation5 + $0x20] sm:$0xff]  ;;  %v179_v22 = vld [vmem:[#allocation5 + $0x18] sm:$0xff] }
  0x24   :  { %377 = vmatmul.mubr.msk.f32.vlgmr.msra.gmra.mxu0 %vm72_vm1, %v62_v4  ;;  %383 = vmatprep.subr.mxu1 %v472_v1  ;;  %v178_v23 = vld [vmem:[#allocation5 + $0x10] sm:$0xff]  ;;  %v177_v24 = vld [vmem:[#allocation5 + $0x8] sm:$0xff]  ;;  %v176_v25 = vld [vmem:[#allocation5] sm:$0xff] }
  0x25   :  { %384 = vmatpush3.msra.mxu1 %v189_v12  ;;  %v347_v35 = vld [vmem:[%s583_s3] ss:$0 sm:$0xff] }
  0x26   :  { %385 = vmatprep.subr.mxu1 %v472_v1  ;;  %v348_v37 = vld [vmem:[%s584_s4] ss:$0 sm:$0xff] }
  0x27   :  { %386 = vmatpush3.msra.mxu1 %v188_v13  ;;  %v349_v41 = vld [vmem:[%s586_s6] ss:$0 sm:$0xff] }
  0x28   :  { %387 = vmatprep.subr.mxu1 %v472_v1  ;;  %v350_v55 = vld [vmem:[%s587_s7] ss:$0 sm:$0xff] }
  0x29   :  { %388 = vmatpush3.msra.mxu1 %v187_v14  ;;  %v351_v58 = vld [vmem:[#allocation2] ss:$0 sm:$0xff] }
  0x2a   :  { %389 = vmatprep.subr.mxu1 %v472_v1 }
  0x2b   :  { %390 = vmatpush3.msra.mxu1 %v186_v15 }
  0x2c   :  { %391 = vmatprep.subr.mxu1 %v472_v1 }
  0x2d   :  { %392 = vmatpush3.msra.mxu1 %v185_v16 }
  0x2e   :  { %393 = vmatprep.subr.mxu1 %v472_v1 }
  0x2f   :  { %394 = vmatpush3.msra.mxu1 %v184_v17 }
  0x30   :  { %395 = vmatprep.subr.mxu1 %v472_v1 }
  0x31   :  { %396 = vmatpush3.msra.mxu1 %v183_v18 }
  0x32   :  { %397 = vmatprep.subr.mxu1 %v472_v1 }
  0x33   :  { %398 = vmatpush3.msra.mxu1 %v182_v19 }
  0x34   :  { %399 = vmatprep.subr.mxu1 %v472_v1 }
  0x35   :  { %400 = vmatpush3.msra.mxu1 %v181_v20 }
  0x36   :  { %401 = vmatprep.subr.mxu1 %v472_v1 }
  0x37   :  { %402 = vmatpush3.msra.mxu1 %v180_v21 }
  0x38   :  { %403 = vmatprep.subr.mxu1 %v472_v1 }
  0x39   :  { %404 = vmatpush3.msra.mxu1 %v179_v22 }
  0x3a   :  { %405 = vmatprep.subr.mxu1 %v472_v1 }
  0x3b   :  { %406 = vmatpush3.msra.mxu1 %v178_v23 }
  0x3c   :  { %407 = vmatprep.subr.mxu1 %v472_v1 }
  0x3d   :  { %408 = vmatpush3.msra.mxu1 %v177_v24 }
  0x3e   :  { %409 = vmatprep.subr.mxu1 %v472_v1 }
  0x3f   :  { %410 = vmatpush3.msra.mxu1 %v176_v25 }
  0xe4   :  { %v142_v6 = vpop.f32.mrf.mxu0 }
  0xe5   :  { %v544_v7 = vadd.f32 %v345_v5, %v142_v6 }
  0xe6   :  { %v378_v8 = vpop.f32.mrf.mxu0 }
  0xe7   :  { %146 = vadd.xlane.f32.xlu0 %v544_v7  ;;  %v149_v9 = vmul.f32 %v544_v7, %v544_v7 }
  0xeb   :  { %150 = vadd.xlane.f32.xlu0 %v149_v9 }
 0x170   :  { %v147_v26 = vpop.xlane.xlu0 %146 }
 0x171   :  { %v148_v27 = vmul.f32 0.03125, %v147_v26 }
 0x173   :  { %v153_v29 = vmul.f32 %v148_v27, %v148_v27  ;;  %v155_v33 = vsub.f32 %v544_v7, %v148_v27 }
 0x174   :  { %v151_v28 = vpop.xlane.xlu0 %150 }
 0x175   :  { %v152_v30 = vmul.f32 0.03125, %v151_v28 }
 0x177   :  { %v154_v31 = vsub.f32 %v152_v30, %v153_v29 }
 0x179   :  { %v156_v32 = vadd.f32 1e-05, %v154_v31 }
 0x17b   :  { %420 = vrsqrt.f32 %v156_v32 }
 0x188   :  { %v421_v34 = vpop.eup %420 }
 0x189   :  { %v158_v36 = vmul.f32 %v421_v34, %v155_v33 }
 0x18b   :  { %v166_v38 = vmul.f32 %v347_v35, %v158_v36 }
 0x18d   :  { %v174_v39 = vadd.f32 %v348_v37, %v166_v38 }
 0x18f   :  { %v175_v40 = vmax.f32 %v174_v39, 0.0 }
 0x191   :  { %412 = vmatmul.mubr.f32.vlgmr.msra.gmra.mxu1 %v175_v40 }
 0x251   :  { %v265_v42 = vpop.f32.mrf.mxu1 }
 0x252   :  { %v266_v43 = vadd.f32 %v349_v41, %v265_v42 }
 0x253   :  { %v413_v44 = vpop.f32.mrf.mxu1 }
 0x254   :  { %269 = vadd.xlane.f32.xlu1 %v266_v43  ;;  %v272_v45 = vmul.f32 %v266_v43, %v266_v43 }
 0x258   :  { %273 = vadd.xlane.f32.xlu1 %v272_v45 }
 0x2dd   :  { %v270_v46 = vpop.xlane.xlu1 %269 }
 0x2de   :  { %v271_v47 = vmul.f32 0.03125, %v270_v46 }
 0x2e0   :  { %v276_v49 = vmul.f32 %v271_v47, %v271_v47  ;;  %v278_v53 = vsub.f32 %v266_v43, %v271_v47 }
 0x2e1   :  { %v274_v48 = vpop.xlane.xlu1 %273 }
 0x2e2   :  { %v275_v50 = vmul.f32 0.03125, %v274_v48 }
 0x2e4   :  { %v277_v51 = vsub.f32 %v275_v50, %v276_v49 }
 0x2e6   :  { %v279_v52 = vadd.f32 1e-05, %v277_v51 }
 0x2e8   :  { %422 = vrsqrt.f32 %v279_v52 }
 0x2f5   :  { %v423_v54 = vpop.eup %422 }
 0x2f6   :  { %v281_v56 = vmul.f32 %v423_v54, %v278_v53 }
 0x2f8   :  { %v289_v57 = vmul.f32 %v350_v55, %v281_v56 }
 0x2fa   :  { %290 = vadd.xlane.f32.xlu0 %v289_v57 }
 0x383   :  { %v291_v59 = vpop.xlane.xlu0 %290 }
 0x384   :  { %v299_v60 = vadd.f32 %v351_v58, %v291_v59 }
 0x386   :  { %301 = vst.msk [vmem:[#allocation7] sm:$0xff] %vm300_vm2, %v299_v60 }
 0x38d   :  { %v320_v61 = vld [vmem:[#allocation7] sm:$0x3] }
 0x38e   :  { %321 = vst [vmem:[%s589_s9] sm:$0x3] %v320_v61 }
 0x38f   :  { %339 = vsyncpa [#allocation4], 1 }
 0x390   :  { %340 = vsyncpa [#allocation6], 1 }

</bundles_post_ra>
